<compile_context>
chip_gen: v7x
topology: tpu7x:2x2x1
jax: 0.10.0
libtpu: 0.0.40
codegen_flags: <defaults>
</compile_context>

<pallas_src>
import math

import jax
import jax.numpy as jnp
from jax import lax
from jax.experimental import pallas as pl
from jax.experimental.pallas import tpu as pltpu


# ----------------------------- config ---------------------------------------
TOKENS_PER_BLOCK = 4
MAX_BLOCKS = 2
ATTENTION = "causal"          # 'causal' or 'block_causal'
NUM_HEADS = 4
EMBED_DIM = 32
MAX_TOKENS = TOKENS_PER_BLOCK * MAX_BLOCKS

B = 2
T = 8                          # sequence length (<= MAX_TOKENS)
C = EMBED_DIM
HD = C // NUM_HEADS
HIDDEN = 4 * C
N = B * T                      # rows after collapsing batch into sublanes
HN = NUM_HEADS * N             # rows after stacking heads
EPS = 1e-5
SLAB_W = max(128, HIDDEN, 3 * C)   # lane width of packed small-parameter slab


# ----------------------------- kernel helpers --------------------------------
def _layernorm(x, g, b):
    mu = jnp.mean(x, axis=-1, keepdims=True)
    var = jnp.mean((x - mu) ** 2, axis=-1, keepdims=True)
    return (x - mu) * lax.rsqrt(var + EPS) * g + b


def _gelu_exact(x):
    # exact (erf-based) GELU, matching torch.nn.GELU() default
    return 0.5 * x * (1.0 + lax.erf(x * (1.0 / math.sqrt(2.0))))


# ----------------------------- kernel ---------------------------------------
def block_kernel(x_ref, bias_ref, wqkv_ref, wp_ref, w1_ref, w2_ref, vec_ref, o_ref):
    x = x_ref[...]                      # (N, C)   all batches, all tokens
    P = vec_ref[...]                    # (8, SLAB_W) packed small parameters
    ln1g = P[0:1, :C]
    ln1b = P[1:2, :C]
    bqkv = P[2:3, :3 * C]               # q-part already scaled by 1/sqrt(HD)
    bp   = P[3:4, :C]
    ln2g = P[4:5, :C]
    ln2b = P[5:6, :C]
    b1   = P[6:7, :HIDDEN]
    b2   = P[7:8, :C]

    # ---- LN1 + fused QKV projection (single MXU matmul) ----
    h = _layernorm(x, ln1g, ln1b)
    qkv = jnp.dot(h, wqkv_ref[...], preferred_element_type=jnp.float32) + bqkv  # (N, 3C)

    # ---- stack heads along rows: (H*N, HD), row order (head, batch, time) ----
    q_s = jnp.concatenate(
        [qkv[:, hh * HD:(hh + 1) * HD] for hh in range(NUM_HEADS)], axis=0)
    k_s = jnp.concatenate(
        [qkv[:, C + hh * HD:C + (hh + 1) * HD] for hh in range(NUM_HEADS)], axis=0)
    v_s = jnp.concatenate(
        [qkv[:, 2 * C + hh * HD:2 * C + (hh + 1) * HD] for hh in range(NUM_HEADS)], axis=0)

    # ---- one QK^T matmul for all heads/batches; structure lives in the additive bias ----
    att = lax.dot_general(q_s, k_s, (((1,), (1,)), ((), ())),
                          preferred_element_type=jnp.float32)                   # (HN, HN)
    att = att + bias_ref[...]                                                   # 0 / -1e30
    att = jnp.exp(att - jnp.max(att, axis=-1, keepdims=True))
    att = att * pl.reciprocal(jnp.sum(att, axis=-1, keepdims=True), approx=True)
    y_s = jnp.dot(att, v_s, preferred_element_type=jnp.float32)                 # (HN, HD)

    # ---- back to (N, C)  ==  'b h t e -> b t (h e)' ----
    y = jnp.concatenate(
        [y_s[hh * N:(hh + 1) * N, :] for hh in range(NUM_HEADS)], axis=1)

    x1 = x + jnp.dot(y, wp_ref[...], preferred_element_type=jnp.float32) + bp   # residual 1

    # ---- LN2 + MLP ----
    h2 = _layernorm(x1, ln2g, ln2b)
    m = jnp.dot(h2, w1_ref[...], preferred_element_type=jnp.float32) + b1
    m = _gelu_exact(m)
    out = x1 + jnp.dot(m, w2_ref[...], preferred_element_type=jnp.float32) + b2 # residual 2
    o_ref[...] = out.astype(o_ref.dtype)


# ----------------------------- wrapper ---------------------------------------
def transformer_block(x, mask, params):
    (ln1g, ln1b, wq, bq, wk, bk, wv, bv, wp, bp,
     ln2g, ln2b, w1, b1, w2, b2) = params

    scale = 1.0 / math.sqrt(HD)
    # fuse QKV and fold the attention scale into the query weight/bias
    wqkv = jnp.concatenate([wq * scale, wk, wv], axis=1)        # (C, 3C)
    bqkv = jnp.concatenate([bq * scale, bk, bv], axis=1)        # (1, 3C)

    # pack the small vectors into a single (8, SLAB_W) slab
    def row(v):
        v = v.reshape(1, -1)
        return jnp.pad(v, ((0, 0), (0, SLAB_W - v.shape[1])))
    slab = jnp.concatenate([row(ln1g), row(ln1b), row(bqkv), row(bp),
                            row(ln2g), row(ln2b), row(b1), row(b2)], axis=0)

    # additive attention bias: block-diagonal over (head, batch) x causal mask
    allow = jnp.kron(jnp.eye(NUM_HEADS * B, dtype=jnp.float32), mask)   # (HN, HN)
    attn_bias = jnp.where(allow > 0, 0.0, -1e30).astype(jnp.float32)

    x2d = x.reshape(N, C)

    full2d = lambda shape: pl.BlockSpec(shape, lambda i: (0, 0))
    out2d = pl.pallas_call(
        block_kernel,
        out_shape=jax.ShapeDtypeStruct((N, C), jnp.float32),
        grid_spec=pltpu.PrefetchScalarGridSpec(
            num_scalar_prefetch=0,
            grid=(1,),
            in_specs=[full2d((N, C)),            # x (all batches collapsed)
                      full2d((HN, HN)),          # additive attention bias
                      full2d((C, 3 * C)),        # fused Wqkv
                      full2d((C, C)),            # Wproj
                      full2d((C, HIDDEN)),       # W1
                      full2d((HIDDEN, C)),       # W2
                      full2d((8, SLAB_W))],      # packed small params
            out_specs=full2d((N, C)),
        ),
        compiler_params=pltpu.CompilerParams(
            dimension_semantics=("arbitrary",)),
    )(x2d, attn_bias, wqkv, wp, w1, w2, slab)
    return out2d.reshape(B, T, C)


# ----------------------------- reference (pure JAX) --------------------------
def reference_block(x, mask, params):
    (ln1g, ln1b, wq, bq, wk, bk, wv, bv, wp, bp,
     ln2g, ln2b, w1, b1, w2, b2) = params

    def ln(x, g, b):
        mu = jnp.mean(x, -1, keepdims=True)
        var = jnp.mean((x - mu) ** 2, -1, keepdims=True)
        return (x - mu) / jnp.sqrt(var + EPS) * g + b

    h = ln(x, ln1g, ln1b)
    q = h @ wq + bq
    k = h @ wk + bk
    v = h @ wv + bv
    q = q.reshape(B, T, NUM_HEADS, HD).transpose(0, 2, 1, 3)
    k = k.reshape(B, T, NUM_HEADS, HD).transpose(0, 2, 1, 3)
    v = v.reshape(B, T, NUM_HEADS, HD).transpose(0, 2, 1, 3)
    att = jnp.einsum('bhtd,bhsd->bhts', q, k) / math.sqrt(HD)
    att = jnp.where(mask[None, None] > 0, att, -jnp.inf)
    att = jax.nn.softmax(att, axis=-1)
    y = jnp.einsum('bhts,bhsd->bhtd', att, v)
    y = y.transpose(0, 2, 1, 3).reshape(B, T, C)
    x1 = x + (y @ wp + bp)
    h2 = ln(x1, ln2g, ln2b)
    m = jax.nn.gelu(h2 @ w1 + b1, approximate=False)
    return x1 + (m @ w2 + b2)


# ----------------------------- params / main ---------------------------------
def init_params(key):
    ks = jax.random.split(key, 8)
    s = 0.02
    ln1g = jnp.ones((1, C), jnp.float32)
    ln1b = jnp.zeros((1, C), jnp.float32)
    ln2g = jnp.ones((1, C), jnp.float32)
    ln2b = jnp.zeros((1, C), jnp.float32)
    wq = s * jax.random.normal(ks[0], (C, C), jnp.float32)
    wk = s * jax.random.normal(ks[1], (C, C), jnp.float32)
    wv = s * jax.random.normal(ks[2], (C, C), jnp.float32)
    wp = s * jax.random.normal(ks[3], (C, C), jnp.float32)
    w1 = s * jax.random.normal(ks[4], (C, HIDDEN), jnp.float32)
    w2 = s * jax.random.normal(ks[5], (HIDDEN, C), jnp.float32)
    bq = s * jax.random.normal(ks[6], (1, C), jnp.float32)
    bk = jnp.zeros((1, C), jnp.float32)
    bv = jnp.zeros((1, C), jnp.float32)
    bp = jnp.zeros((1, C), jnp.float32)
    b1 = s * jax.random.normal(ks[7], (1, HIDDEN), jnp.float32)
    b2 = jnp.zeros((1, C), jnp.float32)
    return (ln1g, ln1b, wq, bq, wk, bk, wv, bv, wp, bp,
            ln2g, ln2b, w1, b1, w2, b2)


def build_mask():
    causal = jnp.tril(jnp.ones((MAX_TOKENS, MAX_TOKENS), jnp.float32))
    blocks = jax.scipy.linalg.block_diag(
        *[jnp.ones((TOKENS_PER_BLOCK, TOKENS_PER_BLOCK), jnp.float32)
          for _ in range(MAX_BLOCKS)])
    block_causal = jnp.maximum(causal, blocks)
    m = causal if ATTENTION == "causal" else block_causal
    return m[0:T, 0:T]                # L = 0 (no kv cache)


if __name__ == "__main__":
    key = jax.random.PRNGKey(0)
    kx, kp = jax.random.split(key)
    x = jax.random.normal(kx, (B, T, C), jnp.float32)
    params = init_params(kp)
    mask = build_mask()

    out = transformer_block(x, mask, params)
    out = jax.block_until_ready(out)

    ref = reference_block(x, mask, params)
    assert out.shape == (B, T, C)
    # tolerance accounts for approx-reciprocal softmax normalization
    assert jnp.allclose(out, ref, atol=1e-3, rtol=1e-3), (
        float(jnp.max(jnp.abs(out - ref))))

    print("KERNEL_OK")
</pallas_src>

<mosaic_0001>
module attributes {stable_mosaic.version = 11 : i64} {
  func.func @block_kernel(%arg0: i32, %arg1: memref<16x32xf32, #tpu.memory_space<vmem>>, %arg2: memref<64x64xf32, #tpu.memory_space<vmem>>, %arg3: memref<32x96xf32, #tpu.memory_space<vmem>>, %arg4: memref<32x32xf32, #tpu.memory_space<vmem>>, %arg5: memref<32x128xf32, #tpu.memory_space<vmem>>, %arg6: memref<128x32xf32, #tpu.memory_space<vmem>>, %arg7: memref<8x128xf32, #tpu.memory_space<vmem>>, %arg8: memref<16x32xf32, #tpu.memory_space<vmem>>) attributes {dimension_semantics = [#tpu.dimension_semantics<arbitrary>], iteration_bounds = array<i64: 1>, scalar_prefetch = 0 : i64, scratch_operands = 0 : i64, tpu.core_type = #tpu.core_type<tc>, window_params = [{pipeline_mode = #tpu.pipeline_mode<synchronous>, transform_indices = @transform_0, window_bounds = array<i64: 16, 32>}, {pipeline_mode = #tpu.pipeline_mode<synchronous>, transform_indices = @transform_1, window_bounds = array<i64: 64, 64>}, {pipeline_mode = #tpu.pipeline_mode<synchronous>, transform_indices = @transform_2, window_bounds = array<i64: 32, 96>}, {pipeline_mode = #tpu.pipeline_mode<synchronous>, transform_indices = @transform_3, window_bounds = array<i64: 32, 32>}, {pipeline_mode = #tpu.pipeline_mode<synchronous>, transform_indices = @transform_4, window_bounds = array<i64: 32, 128>}, {pipeline_mode = #tpu.pipeline_mode<synchronous>, transform_indices = @transform_5, window_bounds = array<i64: 128, 32>}, {pipeline_mode = #tpu.pipeline_mode<synchronous>, transform_indices = @transform_6, window_bounds = array<i64: 8, 128>}, {pipeline_mode = #tpu.pipeline_mode<synchronous>, transform_indices = @transform_7, window_bounds = array<i64: 16, 32>}]} {
    %c0 = arith.constant 0 : index
    %c0_0 = arith.constant 0 : index
    %0 = vector.load %arg1[%c0, %c0_0] : memref<16x32xf32, #tpu.memory_space<vmem>>, vector<16x32xf32>
    %c0_1 = arith.constant 0 : index
    %c0_2 = arith.constant 0 : index
    %1 = vector.load %arg7[%c0_1, %c0_2] : memref<8x128xf32, #tpu.memory_space<vmem>>, vector<8x128xf32>
    %2 = vector.extract_strided_slice %1 {offsets = [0, 0], sizes = [1, 32], strides = [1, 1]} : vector<8x128xf32> to vector<1x32xf32>
    %3 = vector.extract_strided_slice %1 {offsets = [1, 0], sizes = [1, 32], strides = [1, 1]} : vector<8x128xf32> to vector<1x32xf32>
    %4 = vector.extract_strided_slice %1 {offsets = [2, 0], sizes = [1, 96], strides = [1, 1]} : vector<8x128xf32> to vector<1x96xf32>
    %5 = vector.extract_strided_slice %1 {offsets = [3, 0], sizes = [1, 32], strides = [1, 1]} : vector<8x128xf32> to vector<1x32xf32>
    %6 = vector.extract_strided_slice %1 {offsets = [4, 0], sizes = [1, 32], strides = [1, 1]} : vector<8x128xf32> to vector<1x32xf32>
    %7 = vector.extract_strided_slice %1 {offsets = [5, 0], sizes = [1, 32], strides = [1, 1]} : vector<8x128xf32> to vector<1x32xf32>
    %8 = vector.extract_strided_slice %1 {offsets = [6, 0], sizes = [1, 128], strides = [1, 1]} : vector<8x128xf32> to vector<1x128xf32>
    %9 = vector.extract_strided_slice %1 {offsets = [7, 0], sizes = [1, 32], strides = [1, 1]} : vector<8x128xf32> to vector<1x32xf32>
    %cst = arith.constant dense<0.000000e+00> : vector<16xf32>
    %10 = vector.multi_reduction <add>, %0, %cst [1] : vector<16x32xf32> to vector<16xf32>
    %11 = vector.shape_cast %10 : vector<16xf32> to vector<16x1xf32>
    %cst_3 = arith.constant 3.200000e+01 : f32
    %12 = vector.broadcast %cst_3 : f32 to vector<16x1xf32>
    %13 = arith.divf %11, %12 : vector<16x1xf32>
    %14 = vector.broadcast %13 : vector<16x1xf32> to vector<16x32xf32>
    %15 = arith.subf %0, %14 : vector<16x32xf32>
    %16 = arith.mulf %15, %15 : vector<16x32xf32>
    %cst_4 = arith.constant dense<0.000000e+00> : vector<16xf32>
    %17 = vector.multi_reduction <add>, %16, %cst_4 [1] : vector<16x32xf32> to vector<16xf32>
    %18 = vector.shape_cast %17 : vector<16xf32> to vector<16x1xf32>
    %cst_5 = arith.constant 3.200000e+01 : f32
    %19 = vector.broadcast %cst_5 : f32 to vector<16x1xf32>
    %20 = arith.divf %18, %19 : vector<16x1xf32>
    %21 = vector.broadcast %13 : vector<16x1xf32> to vector<16x32xf32>
    %22 = arith.subf %0, %21 : vector<16x32xf32>
    %cst_6 = arith.constant 9.99999974E-6 : f32
    %23 = vector.broadcast %cst_6 : f32 to vector<16x1xf32>
    %24 = arith.addf %20, %23 : vector<16x1xf32>
    %25 = math.rsqrt %24 : vector<16x1xf32>
    %26 = vector.broadcast %25 : vector<16x1xf32> to vector<16x32xf32>
    %27 = arith.mulf %22, %26 : vector<16x32xf32>
    %28 = vector.broadcast %2 : vector<1x32xf32> to vector<16x32xf32>
    %29 = arith.mulf %27, %28 : vector<16x32xf32>
    %30 = vector.broadcast %3 : vector<1x32xf32> to vector<16x32xf32>
    %31 = arith.addf %29, %30 : vector<16x32xf32>
    %c0_7 = arith.constant 0 : index
    %c0_8 = arith.constant 0 : index
    %32 = vector.load %arg3[%c0_7, %c0_8] : memref<32x96xf32, #tpu.memory_space<vmem>>, vector<32x96xf32>
    %cst_9 = arith.constant dense<0.000000e+00> : vector<16x96xf32>
    %33 = tpu.matmul %31, %32, %cst_9 {dimension_numbers = #tpu.dot_dimension_numbers<[1], [0], [0], [1], [0, 0, 1, 1], [], []>} : vector<16x32xf32>, vector<32x96xf32>, vector<16x96xf32> -> vector<16x96xf32>
    %34 = vector.broadcast %4 : vector<1x96xf32> to vector<16x96xf32>
    %35 = arith.addf %33, %34 : vector<16x96xf32>
    %36 = vector.extract_strided_slice %35 {offsets = [0, 0], sizes = [16, 8], strides = [1, 1]} : vector<16x96xf32> to vector<16x8xf32>
    %37 = vector.extract_strided_slice %35 {offsets = [0, 8], sizes = [16, 8], strides = [1, 1]} : vector<16x96xf32> to vector<16x8xf32>
    %38 = vector.extract_strided_slice %35 {offsets = [0, 16], sizes = [16, 8], strides = [1, 1]} : vector<16x96xf32> to vector<16x8xf32>
    %39 = vector.extract_strided_slice %35 {offsets = [0, 24], sizes = [16, 8], strides = [1, 1]} : vector<16x96xf32> to vector<16x8xf32>
    %40 = tpu.concatenate %36, %37, %38, %39 in 0 : vector<16x8xf32>, vector<16x8xf32>, vector<16x8xf32>, vector<16x8xf32> -> vector<64x8xf32>
    %41 = vector.extract_strided_slice %35 {offsets = [0, 32], sizes = [16, 8], strides = [1, 1]} : vector<16x96xf32> to vector<16x8xf32>
    %42 = vector.extract_strided_slice %35 {offsets = [0, 40], sizes = [16, 8], strides = [1, 1]} : vector<16x96xf32> to vector<16x8xf32>
    %43 = vector.extract_strided_slice %35 {offsets = [0, 48], sizes = [16, 8], strides = [1, 1]} : vector<16x96xf32> to vector<16x8xf32>
    %44 = vector.extract_strided_slice %35 {offsets = [0, 56], sizes = [16, 8], strides = [1, 1]} : vector<16x96xf32> to vector<16x8xf32>
    %45 = tpu.concatenate %41, %42, %43, %44 in 0 : vector<16x8xf32>, vector<16x8xf32>, vector<16x8xf32>, vector<16x8xf32> -> vector<64x8xf32>
    %46 = vector.extract_strided_slice %35 {offsets = [0, 64], sizes = [16, 8], strides = [1, 1]} : vector<16x96xf32> to vector<16x8xf32>
    %47 = vector.extract_strided_slice %35 {offsets = [0, 72], sizes = [16, 8], strides = [1, 1]} : vector<16x96xf32> to vector<16x8xf32>
    %48 = vector.extract_strided_slice %35 {offsets = [0, 80], sizes = [16, 8], strides = [1, 1]} : vector<16x96xf32> to vector<16x8xf32>
    %49 = vector.extract_strided_slice %35 {offsets = [0, 88], sizes = [16, 8], strides = [1, 1]} : vector<16x96xf32> to vector<16x8xf32>
    %50 = tpu.concatenate %46, %47, %48, %49 in 0 : vector<16x8xf32>, vector<16x8xf32>, vector<16x8xf32>, vector<16x8xf32> -> vector<64x8xf32>
    %cst_10 = arith.constant dense<0.000000e+00> : vector<64x64xf32>
    %51 = tpu.matmul %40, %45, %cst_10 {dimension_numbers = #tpu.dot_dimension_numbers<[1], [1], [0], [0], [0, 0, 1, 0], [], []>} : vector<64x8xf32>, vector<64x8xf32>, vector<64x64xf32> -> vector<64x64xf32>
    %c0_11 = arith.constant 0 : index
    %c0_12 = arith.constant 0 : index
    %52 = vector.load %arg2[%c0_11, %c0_12] : memref<64x64xf32, #tpu.memory_space<vmem>>, vector<64x64xf32>
    %53 = arith.addf %51, %52 : vector<64x64xf32>
    %cst_13 = arith.constant dense<0xFF800000> : vector<64xf32>
    %54 = vector.multi_reduction <maximumf>, %53, %cst_13 [1] : vector<64x64xf32> to vector<64xf32>
    %55 = vector.shape_cast %54 : vector<64xf32> to vector<64x1xf32>
    %56 = vector.broadcast %55 : vector<64x1xf32> to vector<64x64xf32>
    %57 = arith.subf %53, %56 : vector<64x64xf32>
    %58 = math.exp %57 : vector<64x64xf32>
    %cst_14 = arith.constant dense<0.000000e+00> : vector<64xf32>
    %59 = vector.multi_reduction <add>, %58, %cst_14 [1] : vector<64x64xf32> to vector<64xf32>
    %60 = vector.shape_cast %59 : vector<64xf32> to vector<64x1xf32>
    %61 = tpu.reciprocal %60 {approx = true} : vector<64x1xf32> -> vector<64x1xf32>
    %62 = vector.broadcast %61 : vector<64x1xf32> to vector<64x64xf32>
    %63 = arith.mulf %58, %62 : vector<64x64xf32>
    %cst_15 = arith.constant dense<0.000000e+00> : vector<64x8xf32>
    %64 = tpu.matmul %63, %50, %cst_15 {dimension_numbers = #tpu.dot_dimension_numbers<[1], [0], [0], [1], [0, 0, 1, 1], [], []>} : vector<64x64xf32>, vector<64x8xf32>, vector<64x8xf32> -> vector<64x8xf32>
    %65 = vector.extract_strided_slice %64 {offsets = [0, 0], sizes = [16, 8], strides = [1, 1]} : vector<64x8xf32> to vector<16x8xf32>
    %66 = vector.extract_strided_slice %64 {offsets = [16, 0], sizes = [16, 8], strides = [1, 1]} : vector<64x8xf32> to vector<16x8xf32>
    %67 = vector.extract_strided_slice %64 {offsets = [32, 0], sizes = [16, 8], strides = [1, 1]} : vector<64x8xf32> to vector<16x8xf32>
    %68 = vector.extract_strided_slice %64 {offsets = [48, 0], sizes = [16, 8], strides = [1, 1]} : vector<64x8xf32> to vector<16x8xf32>
    %69 = tpu.concatenate %65, %66, %67, %68 in 1 : vector<16x8xf32>, vector<16x8xf32>, vector<16x8xf32>, vector<16x8xf32> -> vector<16x32xf32>
    %c0_16 = arith.constant 0 : index
    %c0_17 = arith.constant 0 : index
    %70 = vector.load %arg4[%c0_16, %c0_17] : memref<32x32xf32, #tpu.memory_space<vmem>>, vector<32x32xf32>
    %cst_18 = arith.constant dense<0.000000e+00> : vector<16x32xf32>
    %71 = tpu.matmul %69, %70, %cst_18 {dimension_numbers = #tpu.dot_dimension_numbers<[1], [0], [0], [1], [0, 0, 1, 1], [], []>} : vector<16x32xf32>, vector<32x32xf32>, vector<16x32xf32> -> vector<16x32xf32>
    %72 = arith.addf %0, %71 : vector<16x32xf32>
    %73 = vector.broadcast %5 : vector<1x32xf32> to vector<16x32xf32>
    %74 = arith.addf %72, %73 : vector<16x32xf32>
    %cst_19 = arith.constant dense<0.000000e+00> : vector<16xf32>
    %75 = vector.multi_reduction <add>, %74, %cst_19 [1] : vector<16x32xf32> to vector<16xf32>
    %76 = vector.shape_cast %75 : vector<16xf32> to vector<16x1xf32>
    %cst_20 = arith.constant 3.200000e+01 : f32
    %77 = vector.broadcast %cst_20 : f32 to vector<16x1xf32>
    %78 = arith.divf %76, %77 : vector<16x1xf32>
    %79 = vector.broadcast %78 : vector<16x1xf32> to vector<16x32xf32>
    %80 = arith.subf %74, %79 : vector<16x32xf32>
    %81 = arith.mulf %80, %80 : vector<16x32xf32>
    %cst_21 = arith.constant dense<0.000000e+00> : vector<16xf32>
    %82 = vector.multi_reduction <add>, %81, %cst_21 [1] : vector<16x32xf32> to vector<16xf32>
    %83 = vector.shape_cast %82 : vector<16xf32> to vector<16x1xf32>
    %cst_22 = arith.constant 3.200000e+01 : f32
    %84 = vector.broadcast %cst_22 : f32 to vector<16x1xf32>
    %85 = arith.divf %83, %84 : vector<16x1xf32>
    %86 = vector.broadcast %78 : vector<16x1xf32> to vector<16x32xf32>
    %87 = arith.subf %74, %86 : vector<16x32xf32>
    %cst_23 = arith.constant 9.99999974E-6 : f32
    %88 = vector.broadcast %cst_23 : f32 to vector<16x1xf32>
    %89 = arith.addf %85, %88 : vector<16x1xf32>
    %90 = math.rsqrt %89 : vector<16x1xf32>
    %91 = vector.broadcast %90 : vector<16x1xf32> to vector<16x32xf32>
    %92 = arith.mulf %87, %91 : vector<16x32xf32>
    %93 = vector.broadcast %6 : vector<1x32xf32> to vector<16x32xf32>
    %94 = arith.mulf %92, %93 : vector<16x32xf32>
    %95 = vector.broadcast %7 : vector<1x32xf32> to vector<16x32xf32>
    %96 = arith.addf %94, %95 : vector<16x32xf32>
    %c0_24 = arith.constant 0 : index
    %c0_25 = arith.constant 0 : index
    %97 = vector.load %arg5[%c0_24, %c0_25] : memref<32x128xf32, #tpu.memory_space<vmem>>, vector<32x128xf32>
    %cst_26 = arith.constant dense<0.000000e+00> : vector<16x128xf32>
    %98 = tpu.matmul %96, %97, %cst_26 {dimension_numbers = #tpu.dot_dimension_numbers<[1], [0], [0], [1], [0, 0, 1, 1], [], []>} : vector<16x32xf32>, vector<32x128xf32>, vector<16x128xf32> -> vector<16x128xf32>
    %99 = vector.broadcast %8 : vector<1x128xf32> to vector<16x128xf32>
    %100 = arith.addf %98, %99 : vector<16x128xf32>
    %cst_27 = arith.constant 5.000000e-01 : f32
    %101 = vector.broadcast %cst_27 : f32 to vector<16x128xf32>
    %102 = arith.mulf %101, %100 : vector<16x128xf32>
    %cst_28 = arith.constant 0.707106769 : f32
    %103 = vector.broadcast %cst_28 : f32 to vector<16x128xf32>
    %104 = arith.mulf %100, %103 : vector<16x128xf32>
    %105 = math.erf %104 : vector<16x128xf32>
    %cst_29 = arith.constant 1.000000e+00 : f32
    %106 = vector.broadcast %cst_29 : f32 to vector<16x128xf32>
    %107 = arith.addf %106, %105 : vector<16x128xf32>
    %108 = arith.mulf %102, %107 : vector<16x128xf32>
    %c0_30 = arith.constant 0 : index
    %c0_31 = arith.constant 0 : index
    %109 = vector.load %arg6[%c0_30, %c0_31] : memref<128x32xf32, #tpu.memory_space<vmem>>, vector<128x32xf32>
    %cst_32 = arith.constant dense<0.000000e+00> : vector<16x32xf32>
    %110 = tpu.matmul %108, %109, %cst_32 {dimension_numbers = #tpu.dot_dimension_numbers<[1], [0], [0], [1], [0, 0, 1, 1], [], []>} : vector<16x128xf32>, vector<128x32xf32>, vector<16x32xf32> -> vector<16x32xf32>
    %111 = arith.addf %74, %110 : vector<16x32xf32>
    %112 = vector.broadcast %9 : vector<1x32xf32> to vector<16x32xf32>
    %113 = arith.addf %111, %112 : vector<16x32xf32>
    %c0_33 = arith.constant 0 : index
    %c0_34 = arith.constant 0 : index
    %114 = vector.load %arg8[%c0_33, %c0_34] : memref<16x32xf32, #tpu.memory_space<vmem>>, vector<16x32xf32>
    tpu.vector_store %arg8[%c0_33, %c0_34], %113 {strides = array<i32>} : memref<16x32xf32, #tpu.memory_space<vmem>>, vector<16x32xf32>,
    return
  }
  func.func @transform_0(%arg0: i32) -> (i32, i32) {
    %c0_i32 = arith.constant 0 : i32
    %c0_i32_0 = arith.constant 0 : i32
    %c0_i32_1 = arith.constant 0 : i32
    return %c0_i32, %c0_i32_0 : i32, i32
  }
  func.func @transform_1(%arg0: i32) -> (i32, i32) {
    %c0_i32 = arith.constant 0 : i32
    %c0_i32_0 = arith.constant 0 : i32
    %c0_i32_1 = arith.constant 0 : i32
    return %c0_i32, %c0_i32_0 : i32, i32
  }
  func.func @transform_2(%arg0: i32) -> (i32, i32) {
    %c0_i32 = arith.constant 0 : i32
    %c0_i32_0 = arith.constant 0 : i32
    %c0_i32_1 = arith.constant 0 : i32
    return %c0_i32, %c0_i32_0 : i32, i32
  }
  func.func @transform_3(%arg0: i32) -> (i32, i32) {
    %c0_i32 = arith.constant 0 : i32
    %c0_i32_0 = arith.constant 0 : i32
    %c0_i32_1 = arith.constant 0 : i32
    return %c0_i32, %c0_i32_0 : i32, i32
  }
  func.func @transform_4(%arg0: i32) -> (i32, i32) {
    %c0_i32 = arith.constant 0 : i32
    %c0_i32_0 = arith.constant 0 : i32
    %c0_i32_1 = arith.constant 0 : i32
    return %c0_i32, %c0_i32_0 : i32, i32
  }
  func.func @transform_5(%arg0: i32) -> (i32, i32) {
    %c0_i32 = arith.constant 0 : i32
    %c0_i32_0 = arith.constant 0 : i32
    %c0_i32_1 = arith.constant 0 : i32
    return %c0_i32, %c0_i32_0 : i32, i32
  }
  func.func @transform_6(%arg0: i32) -> (i32, i32) {
    %c0_i32 = arith.constant 0 : i32
    %c0_i32_0 = arith.constant 0 : i32
    %c0_i32_1 = arith.constant 0 : i32
    return %c0_i32, %c0_i32_0 : i32, i32
  }
  func.func @transform_7(%arg0: i32) -> (i32, i32) {
    %c0_i32 = arith.constant 0 : i32
    %c0_i32_0 = arith.constant 0 : i32
    %c0_i32_1 = arith.constant 0 : i32
    return %c0_i32, %c0_i32_0 : i32, i32
  }
}

</mosaic_0001>

<bundles_post_ra>
// kernel: tpu_custom_call.1
= control target key start
LH: loop header
LB: loop body
LE: loop exit
PB: predicated region body
PF: predicated region fallthrough
CT: control target
= control target key end

     0   :  { %12 = vsyncpa [#allocation3], 0  ;;  %s1774_s0 = inlined_call_operand.hbm [shape: f32[16,32], index: 0, kind: input, shape index: {}]   ;;  %s1775_s1 = inlined_call_operand.vmem [shape: f32[64,64], index: 1, kind: input, shape index: {}]   ;;  %s1776_s2 = inlined_call_operand.vmem [shape: f32[32,96], index: 2, kind: input, shape index: {}]   ;;  %s1777_s3 = inlined_call_operand.vmem [shape: f32[32,32], index: 3, kind: input, shape index: {}]   ;;  %s1778_s4 = inlined_call_operand.vmem [shape: f32[32,128], index: 4, kind: input, shape index: {}]   ;;  %s1779_s5 = inlined_call_operand.vmem [shape: f32[128,32], index: 5, kind: input, shape index: {}]   ;;  %s1780_s6 = inlined_call_operand.vmem [shape: f32[8,128], index: 6, kind: input, shape index: {}]   ;;  %s1781_s7 = inlined_call_operand.hbm [shape: f32[16,32], index: 7, kind: output, shape index: {}]  }
   0x1   :  { %13 = vsyncpa [#allocation4], 0  ;;  %s1432_s24 = smov [#allocation2]   ;;  %s1384_s28 = scalar_lea.hbm %s1774_s0, 256 }
   0x2   :  { %s19_s25 = sshll.u32 %s1432_s24, 4  ;;  %p1385_p0 = scmp.ne.s32.totalorder %s1774_s0, %s1384_s28  ;;  %s20_s25 = int_to_ptr.vmem [resolvable:$true] %s19_s25 }
   0x3   :  { %p1388_p1 = scmp.lt.u32.totalorder %s1384_s28, %s1774_s0 }
   0x5   :  { %p1390_p2 = pnand %p1388_p1, %p1385_p0 }
   0x7   :  { %1393 = shalt.err (!%p1390_p2)
}
   0x8   :  { %s1394_s10 = scalar_lea.vmem %s20_s25, 256  ;;  %p1399_p4 = scmp.lt.s32.totalorder %s20_s25, %s20_s25 }
   0x9   :  { %p1395_p3 = scmp.ne.s32.totalorder %s20_s25, %s1394_s10  ;;  %p1400_p5 = scmp.lt.s32.totalorder %s1394_s10, %s1394_s10 }
   0xb   :  { %p1401_p6 = por %p1400_p5, %p1399_p4 }
   0xd   :  { %p1402_p7 = pnand %p1401_p6, %p1395_p3 }
   0xf   :  { %1405 = shalt.err (!%p1402_p7)
}
  0x10   :  { %s1433_s11 = smov 128   ;;  %s1434_s12 = smov 8  }
  0x11   :  { %25 = dma.hbm_to_vmem [thread:$0]  %s1774_s0, 256, %s20_s25, [#allocation3], %s1433_s11, %s1433_s11, %s1434_s12  }
  0x12   :  { %1428 = dma.done.wait [#allocation3], 256  }
  0x13   :  { %1429 = vsyncadd [#allocation3], 4294967040  ;;  %vm44_vm0 = vcmask 261120   ;;  %v1498_v0 = vld [vmem:[#allocation2] sm:$0xff]  ;;  %v1500_v1 = vld [vmem:[#allocation2 + $0x8] sm:$0xff]  ;;  %v72_v22 = vlaneseq  ;;  %vm211_vm1 = vcmask 64512  }
  0x14   :  { %v45_v2 = vsel %vm44_vm0, %v1498_v0, 0.0  ;;  %v48_v3 = vsel %vm44_vm0, %v1500_v1, 0.0  ;;  %v84_v14 = vld [vmem:[%s1776_s2] sm:$0xff]  ;;  %v85_v15 = vld [vmem:[%s1776_s2 + $0x8] sm:$0xff]  ;;  %v86_v16 = vld [vmem:[%s1776_s2 + $0x10] sm:$0xff]  ;;  %s1436_s23 = smov 112  }
  0x15   :  { %46 = vadd.xlane.f32.xlu0 %v45_v2  ;;  %v1193_v17 = vpack.c.bf16 %v85_v15, %v84_v14  ;;  %v87_v18 = vld [vmem:[%s1776_s2 + $0x18] sm:$0xff]  ;;  %v1522_v26 = vshrl.u32 %v72_v22, 7  ;;  %v1528_v29 = vld [vmem:[%s1780_s6] sm:$0xff]  ;;  %s1435_s6 = smov 120   ;;  %s1437_s24 = smov 104   ;;  %vm1549_vm2 = vmpackc.low %vm211_vm1, %vm211_vm1  ;;  %vm349_vm3 = vcmask 523264  }
  0x16   :  { %v1197_v19 = vpack.c.bf16 %v87_v18, %v86_v16  ;;  %s1438_s25 = smov 96   ;;  %v190_v18 = vld [vmem:[%s1775_s1 + $0x18] sm:$0xff]  ;;  %s1439_s20 = smov 64   ;;  %vm617_vm4 = vcmask 130048   ;;  %vm620_vm5 = vcmask 195584  }
  0x17   :  { %1194 = vmatprep.subr.bf16.mxu0 %v1193_v17  ;;  %v74_v28 = vsub.s32 0, %v1522_v26  ;;  %v80_v30 = vsub.s32 1, %v1522_v26  ;;  %v90_v41 = vsub.s32 2, %v1522_v26  ;;  %s1440_s26 = smov 16   ;;  %s1441_s27 = smov 24  }
  0x18   :  { %1196 = vmatpush3.bf16.msra.mxu0 %v1193_v17 }
  0x19   :  { %49 = vadd.xlane.f32.xlu0 %v48_v3  ;;  %1198 = vmatprep.subr.bf16.mxu0 %v1197_v19  ;;  %v75_v31 = vrot.slane %v1528_v29, %v74_v28  ;;  %v81_v34 = vrot.slane %v1528_v29, %v80_v30  ;;  %v91_v42 = vrot.slane %v1528_v29, %v90_v41  ;;  %v193_v41 = vld [vmem:[%s1775_s1 + $0x30] sm:$0xff] }
  0x1c   :  { %1200 = vmatpush3.bf16.msra.mxu0 %v1197_v19 }
  0xa2   :  { %v47_v4 = vpop.xlane.xlu0 %46 }
  0xa3   :  { %v52_v5 = vmul.f32 0.03125, %v47_v4 }
  0xa5   :  { %v54_v6 = vsub.f32 %v1498_v0, %v52_v5 }
  0xa6   :  { %v50_v7 = vpop.xlane.xlu0 %49 }
  0xa7   :  { %v53_v8 = vmul.f32 0.03125, %v50_v7  ;;  %v56_v9 = vmul.f32 %v54_v6, %v54_v6 }
  0xa9   :  { %v55_v10 = vsub.f32 %v1500_v1, %v53_v8  ;;  %v58_v11 = vsel %vm44_vm0, %v56_v9, 0.0 }
  0xaa   :  { %59 = vadd.xlane.f32.xlu1 %v58_v11 }
  0xab   :  { %v57_v12 = vmul.f32 %v55_v10, %v55_v10 }
  0xad   :  { %v61_v13 = vsel %vm44_vm0, %v57_v12, 0.0  ;;  %v188_v12 = vld [vmem:[%s1775_s1 + $0x8] sm:$0xff] }
  0xae   :  { %62 = vadd.xlane.f32.xlu1 %v61_v13  ;;  %v187_v13 = vld [vmem:[%s1775_s1] sm:$0xff] }
 0x137   :  { %v60_v20 = vpop.xlane.xlu1 %59 }
 0x138   :  { %v64_v21 = vmul.f32 0.03125, %v60_v20 }
 0x13a   :  { %v66_v23 = vadd.f32 1e-05, %v64_v21 }
 0x13b   :  { %v63_v24 = vpop.xlane.xlu1 %62 }
 0x13c   :  { %1340 = vrsqrt.f32 %v66_v23  ;;  %v65_v25 = vmul.f32 0.03125, %v63_v24  ;;  %v189_v24 = vld [vmem:[%s1775_s1 + $0x10] sm:$0xff] }
 0x13e   :  { %v67_v27 = vadd.f32 1e-05, %v65_v25  ;;  %v192_v25 = vld [vmem:[%s1775_s1 + $0x28] sm:$0xff] }
 0x140   :  { %1342 = vrsqrt.f32 %v67_v27 }
 0x146   :  { %v1341_v32 = vpop.eup %1340 }
 0x147   :  { %v70_v33 = vmul.f32 %v1341_v32, %v54_v6 }
 0x149   :  { %v76_v35 = vmul.f32 %v75_v31, %v70_v33  ;;  %v191_v33 = vld [vmem:[%s1775_s1 + $0x20] sm:$0xff] }
 0x14a   :  { %v1343_v36 = vpop.eup %1342 }
 0x14b   :  { %v71_v37 = vmul.f32 %v1343_v36, %v55_v10  ;;  %v82_v38 = vadd.f32 %v81_v34, %v76_v35 }
 0x14d   :  { %v77_v39 = vmul.f32 %v75_v31, %v71_v37  ;;  %1077 = vmatprep.mubr.msk.f32.mxu0 %vm44_vm0, %v82_v38 }
 0x14f   :  { %v83_v40 = vadd.f32 %v81_v34, %v77_v39  ;;  %v194_v34 = vld [vmem:[%s1775_s1 + $0x38] sm:$0xff] }
 0x151   :  { %1078 = vmatmul.mubr.msk.f32.vlgmr.msra.gmra.mrb[0].mxu0 %vm44_vm0, %v83_v40 }
 0x224   :  { %v1079_v43 = vpop.f32.mrb[0].mxu0 }
 0x225   :  { %v170_v44 = vadd.f32 %v1079_v43, %v91_v42  ;;  %v164_v45 = vpop.f32.mrb[1].mxu0 }
 0x226   :  { %v165_v46 = vadd.f32 %v164_v45, %v91_v42 }
 0x227   :  { %177 = vrot.lane.b32.xlu1 %v170_v44, %s1435_s6 }
 0x228   :  { %175 = vrot.lane.b32.xlu0 %v165_v46, %s1435_s6  ;;  %1096 = vmatprep.mubr.msk.f32.mxu1 %vm211_vm1, %v165_v46  ;;  %v1538_v47 = vpack.i.bf16 %v170_v44, %v165_v46 }
 0x22b   :  { %179 = vrot.lane.b32.xlu1 %v165_v46, %s1436_s23 }
 0x22c   :  { %183 = vrot.lane.b32.xlu0 %v165_v46, %s1437_s24 }
 0x22f   :  { %181 = vrot.lane.b32.xlu1 %v170_v44, %s1436_s23 }
 0x230   :  { %1301 = vrot.lane.b32.xlu0 %v1538_v47, %s1438_s25 }
 0x233   :  { %185 = vrot.lane.b32.xlu1 %v170_v44, %s1437_s24 }
 0x299   :  { %v178_v48 = vpop.permute.xlu1 %177 }
 0x29a   :  { %v176_v49 = vpop.permute.xlu0 %175 }
 0x29b   :  { %v1541_v50 = vpack.i.bf16 %v178_v48, %v176_v49 }
 0x29d   :  { %v180_v51 = vpop.permute.xlu1 %179  ;;  %1306 = vrot.lane.b32.xlu1 %v1541_v50, %s1438_s25 }
 0x29e   :  { %v184_v52 = vpop.permute.xlu0 %183 }
 0x2a1   :  { %v182_v53 = vpop.permute.xlu1 %181 }
 0x2a2   :  { %v1544_v54 = vpack.i.bf16 %v182_v53, %v180_v51  ;;  %v1302_v55 = vpop.permute.xlu0 %1301 }
 0x2a3   :  { %v1304_v56 = vunpack.i.h.bf16 %v1302_v55  ;;  %v1303_v57 = vunpack.i.l.bf16 %v1302_v55 }
 0x2a4   :  { %1311 = vrot.lane.b32.xlu0 %v1544_v54, %s1438_s25 }
 0x2a5   :  { %v186_v59 = vpop.permute.xlu1 %185  ;;  %v1201_v60 = vpack.c.bf16 %v1304_v56, %v1303_v57 }
 0x2a6   :  { %v1553_v61 = vpack.i.bf16 %v186_v59, %v184_v52 }
 0x2a7   :  { %1203 = vmatprep.subr.msk.bf16.mxu1 %vm1549_vm2, %v1201_v60 }
 0x2a8   :  { %1316 = vrot.lane.b32.xlu1 %v1553_v61, %s1438_s25  ;;  %1206 = vmatpush3.bf16.xpose.msk.msra.mxu1 %vm1549_vm2, %v1201_v60 }
 0x30f   :  { %v1307_v62 = vpop.permute.xlu1 %1306 }
 0x310   :  { %v1309_v63 = vunpack.i.h.bf16 %v1307_v62  ;;  %v1308_v2 = vunpack.i.l.bf16 %v1307_v62 }
 0x312   :  { %v1207_v3 = vpack.c.bf16 %v1309_v63, %v1308_v2 }
 0x314   :  { %1209 = vmatprep.subr.msk.bf16.mxu1 %vm1549_vm2, %v1207_v3 }
 0x315   :  { %1212 = vmatpush3.bf16.xpose.msk.msra.mxu1 %vm1549_vm2, %v1207_v3 }
 0x316   :  { %v1312_v4 = vpop.permute.xlu0 %1311 }
 0x317   :  { %v1314_v5 = vunpack.i.h.bf16 %v1312_v4  ;;  %v1313_v6 = vunpack.i.l.bf16 %v1312_v4 }
 0x319   :  { %v1213_v7 = vpack.c.bf16 %v1314_v5, %v1313_v6 }
 0x31a   :  { %v1317_v8 = vpop.permute.xlu1 %1316 }
 0x31b   :  { %v1319_v9 = vunpack.i.h.bf16 %v1317_v8  ;;  %v1318_v10 = vunpack.i.l.bf16 %v1317_v8  ;;  %1215 = vmatprep.subr.msk.bf16.mxu1 %vm1549_vm2, %v1213_v7 }
 0x31d   :  { %v1219_v11 = vpack.c.bf16 %v1319_v9, %v1318_v10  ;;  %1218 = vmatpush3.bf16.xpose.msk.msra.mxu1 %vm1549_vm2, %v1213_v7 }
 0x31f   :  { %1221 = vmatprep.subr.msk.bf16.mxu1 %vm1549_vm2, %v1219_v11 }
 0x325   :  { %1224 = vmatpush3.bf16.xpose.msk.msra.mxu1 %vm1549_vm2, %v1219_v11 }
 0x32c   :  { %1097 = vmatmul.mubr.msk.f32.vlgmr.msra.gmra.mrb[0].mxu1 %vm211_vm1, %v170_v44 }
 0x32d   :  { %1099 = vmatprep.mubr.msk.f32.mxu1 %vm211_vm1, %v176_v49 }
 0x330   :  { %1100 = vmatmul.mubr.msk.f32.gmra.mrb[2].mxu1 %vm211_vm1, %v178_v48 }
 0x331   :  { %1102 = vmatprep.mubr.msk.f32.mxu1 %vm211_vm1, %v180_v51 }
 0x334   :  { %1103 = vmatmul.mubr.msk.f32.gmra.mrb[4].mxu1 %vm211_vm1, %v182_v53 }
 0x335   :  { %1105 = vmatprep.mubr.msk.f32.mxu1 %vm211_vm1, %v184_v52 }
 0x338   :  { %1106 = vmatmul.mubr.msk.f32.gmra.mrb[6].mxu1 %vm211_vm1, %v186_v59 }
 0x3ff   :  { %v1098_v14 = vpop.f32.mrb[0].mxu1 }
 0x400   :  { %v316_v15 = vadd.f32 %v1098_v14, %v188_v12  ;;  %v310_v16 = vpop.f32.mrb[1].mxu1 }
 0x401   :  { %v311_v17 = vadd.f32 %v310_v16, %v187_v13 }
 0x402   :  { %v353_v19 = vsel %vm349_vm3, %v316_v15, -inf }
 0x403   :  { %354 = vmax.xlane.f32.xlu1 %v353_v19  ;;  %v1101_v20 = vpop.f32.mrb[2].mxu1  ;;  %v350_v21 = vsel %vm349_vm3, %v311_v17, -inf }
 0x404   :  { %v326_v22 = vadd.f32 %v1101_v20, %v190_v18  ;;  %v320_v23 = vpop.f32.mrb[3].mxu1  ;;  %351 = vmax.xlane.f32.xlu0 %v350_v21 }
 0x405   :  { %v321_v28 = vadd.f32 %v320_v23, %v189_v24 }
 0x406   :  { %v359_v27 = vsel %vm349_vm3, %v326_v22, -inf }
 0x407   :  { %v1104_v30 = vpop.f32.mrb[4].mxu1  ;;  %v356_v38 = vsel %vm349_vm3, %v321_v28, -inf }
 0x408   :  { %v336_v31 = vadd.f32 %v1104_v30, %v192_v25  ;;  %v330_v32 = vpop.f32.mrb[5].mxu1  ;;  %360 = vmax.xlane.f32.xlu0 %v359_v27 }
 0x409   :  { %v331_v36 = vadd.f32 %v330_v32, %v191_v33 }
 0x40a   :  { %v365_v35 = vsel %vm349_vm3, %v336_v31, -inf }
 0x40b   :  { %366 = vmax.xlane.f32.xlu1 %v365_v35  ;;  %v1107_v37 = vpop.f32.mrb[6].mxu1  ;;  %v362_v44 = vsel %vm349_vm3, %v331_v36, -inf }
 0x40c   :  { %v346_v39 = vadd.f32 %v1107_v37, %v194_v34  ;;  %v340_v40 = vpop.f32.mrb[7].mxu1  ;;  %357 = vmax.xlane.f32.xlu0 %v356_v38 }
 0x40d   :  { %v341_v43 = vadd.f32 %v340_v40, %v193_v41 }
 0x40e   :  { %v371_v42 = vsel %vm349_vm3, %v346_v39, -inf }
 0x40f   :  { %372 = vmax.xlane.f32.xlu1 %v371_v42  ;;  %v368_v45 = vsel %vm349_vm3, %v341_v43, -inf }
 0x410   :  { %363 = vmax.xlane.f32.xlu0 %v362_v44 }
 0x414   :  { %369 = vmax.xlane.f32.xlu0 %v368_v45 }
 0x420   :  { %1326 = vrot.lane.b32.xlu1 %v1541_v50, %s1439_s20 }
 0x42a   :  { %1321 = vrot.lane.b32.xlu0 %v1538_v47, %s1439_s20 }
 0x490   :  { %v355_v46 = vpop.xlane.xlu1 %354 }
 0x491   :  { %v375_v48 = vsub.f32 %v316_v15, %v355_v46  ;;  %v352_v49 = vpop.xlane.xlu0 %351 }
 0x492   :  { %v374_v51 = vsub.f32 %v311_v17, %v352_v49 }
 0x493   :  { %v384_v52 = vmul.f32 1.442695, %v375_v48 }
 0x494   :  { %v382_v53 = vmul.f32 1.442695, %v374_v51 }
 0x495   :  { %1344 = vpow2.f32 %v384_v52  ;;  %v361_v55 = vpop.xlane.xlu0 %360 }
 0x496   :  { %1346 = vpow2.f32 %v382_v53  ;;  %v377_v56 = vsub.f32 %v326_v22, %v361_v55 }
 0x498   :  { %v388_v57 = vmul.f32 1.442695, %v377_v56  ;;  %v367_v58 = vpop.xlane.xlu1 %366 }
 0x499   :  { %v379_v59 = vsub.f32 %v336_v31, %v367_v58  ;;  %v358_v60 = vpop.xlane.xlu0 %357 }
 0x49a   :  { %1348 = vpow2.f32 %v388_v57  ;;  %v376_v62 = vsub.f32 %v321_v28, %v358_v60 }
 0x49b   :  { %v392_v50 = vmul.f32 1.442695, %v379_v59 }
 0x49c   :  { %v386_v63 = vmul.f32 1.442695, %v376_v62  ;;  %v373_v2 = vpop.xlane.xlu1 %372 }
 0x49d   :  { %1350 = vpow2.f32 %v392_v50  ;;  %v381_v47 = vsub.f32 %v346_v39, %v373_v2  ;;  %v364_v3 = vpop.xlane.xlu0 %363 }
 0x49e   :  { %1352 = vpow2.f32 %v386_v63  ;;  %v378_v4 = vsub.f32 %v331_v36, %v364_v3 }
 0x49f   :  { %v1615_v5 = vpop.eup %1344  ;;  %v396_v6 = vmul.f32 1.442695, %v381_v47 }
 0x4a0   :  { %v1347_v7 = vpop.eup %1346  ;;  %v390_v8 = vmul.f32 1.442695, %v378_v4  ;;  %v401_v9 = vsel %vm349_vm3, %v1615_v5, 0.0  ;;  %v1327_v14 = vpop.permute.xlu1 %1326 }
 0x4a1   :  { %1354 = vpow2.f32 %v396_v6  ;;  %402 = vadd.xlane.f32.xlu1 %v401_v9  ;;  %v370_v10 = vpop.xlane.xlu0 %369  ;;  %v398_v11 = vsel %vm349_vm3, %v1347_v7, 0.0  ;;  %v1329_v21 = vunpack.i.h.bf16 %v1327_v14  ;;  %v1328_v22 = vunpack.i.l.bf16 %v1327_v14  ;;  %v623_v6 = vld [vmem:[%s1777_s3] sm:$0xff]  ;;  %v625_v9 = vld [vmem:[%s1777_s3 + $0x10] sm:$0xff] }
 0x4a2   :  { %1356 = vpow2.f32 %v390_v8  ;;  %v380_v12 = vsub.f32 %v341_v43, %v370_v10  ;;  %399 = vadd.xlane.f32.xlu0 %v398_v11  ;;  %v626_v10 = vld [vmem:[%s1777_s3 + $0x18] sm:$0xff] }
 0x4a3   :  { %v1229_v30 = vpack.c.bf16 %v1329_v21, %v1328_v22  ;;  %v1245_v11 = vpack.c.bf16 %v626_v10, %v625_v9 }
 0x4a4   :  { %v1620_v13 = vpop.eup %1348  ;;  %v394_v15 = vmul.f32 1.442695, %v380_v12 }
 0x4a5   :  { %v1322_v16 = vpop.permute.xlu0 %1321  ;;  %v407_v17 = vsel %vm349_vm3, %v1620_v13, 0.0 }
 0x4a6   :  { %1358 = vpow2.f32 %v394_v15  ;;  %v1324_v18 = vunpack.i.h.bf16 %v1322_v16  ;;  %v1323_v19 = vunpack.i.l.bf16 %v1322_v16  ;;  %408 = vadd.xlane.f32.xlu1 %v407_v17 }
 0x4a7   :  { %v1624_v20 = vpop.eup %1350 }
 0x4a8   :  { %v1353_v23 = vpop.eup %1352  ;;  %v1225_v24 = vpack.c.bf16 %v1324_v18, %v1323_v19  ;;  %v413_v25 = vsel %vm349_vm3, %v1624_v20, 0.0 }
 0x4a9   :  { %v404_v27 = vsel %vm349_vm3, %v1353_v23, 0.0 }
 0x4aa   :  { %414 = vadd.xlane.f32.xlu1 %v413_v25  ;;  %405 = vadd.xlane.f32.xlu0 %v404_v27 }
 0x4ab   :  { %v1629_v28 = vpop.eup %1354  ;;  %1226 = vmatprep.subr.bf16.mxu0 %v1225_v24 }
 0x4ac   :  { %v1357_v31 = vpop.eup %1356  ;;  %1228 = vmatpush3.bf16.msra.mxu0 %v1225_v24  ;;  %v419_v32 = vsel %vm349_vm3, %v1629_v28, 0.0 }
 0x4ad   :  { %1230 = vmatprep.subr.bf16.mxu0 %v1229_v30  ;;  %v410_v33 = vsel %vm349_vm3, %v1357_v31, 0.0 }
 0x4ae   :  { %420 = vadd.xlane.f32.xlu1 %v419_v32  ;;  %411 = vadd.xlane.f32.xlu0 %v410_v33 }
 0x4b0   :  { %v1359_v34 = vpop.eup %1358  ;;  %1232 = vmatpush3.bf16.msra.mxu0 %v1229_v30 }
 0x4b1   :  { %v416_v35 = vsel %vm349_vm3, %v1359_v34, 0.0 }
 0x4b2   :  { %417 = vadd.xlane.f32.xlu1 %v416_v35 }
 0x4c3   :  { %1336 = vrot.lane.b32.xlu1 %v1553_v61, %s1439_s20 }
 0x4c4   :  { %1331 = vrot.lane.b32.xlu0 %v1544_v54, %s1439_s20 }
 0x52e   :  { %v403_v36 = vpop.xlane.xlu1 %402 }
 0x52f   :  { %v400_v37 = vpop.xlane.xlu0 %399 }
 0x530   :  { %1360 = vrcp.f32 %v400_v37 }
 0x531   :  { %1362 = vrcp.f32 %v403_v36 }
 0x533   :  { %v409_v38 = vpop.xlane.xlu1 %408 }
 0x537   :  { %v415_v39 = vpop.xlane.xlu1 %414  ;;  %v406_v40 = vpop.xlane.xlu0 %405 }
 0x538   :  { %1364 = vrcp.f32 %v406_v40 }
 0x539   :  { %1366 = vrcp.f32 %v409_v38 }
 0x53a   :  { %v1361_v41 = vpop.eup %1360 }
 0x53b   :  { %v421_v42 = vpop.xlane.xlu1 %420  ;;  %v412_v43 = vpop.xlane.xlu0 %411  ;;  %v430_v44 = vmul.f32 %v1361_v41, %v1347_v7  ;;  %v624_v7 = vld [vmem:[%s1777_s3 + $0x8] sm:$0xff] }
 0x53c   :  { %1368 = vrcp.f32 %v412_v43  ;;  %v1363_v55 = vpop.eup %1362  ;;  %v1241_v8 = vpack.c.bf16 %v624_v7, %v623_v6 }
 0x53d   :  { %1124 = vmatprep.mubr.msk.f32.mxu0 %vm349_vm3, %v430_v44  ;;  %1370 = vrcp.f32 %v415_v39  ;;  %v431_v57 = vmul.f32 %v1363_v55, %v1615_v5 }
 0x53f   :  { %v418_v45 = vpop.xlane.xlu1 %417  ;;  %v1332_v46 = vpop.permute.xlu0 %1331 }
 0x540   :  { %v1334_v61 = vunpack.i.h.bf16 %v1332_v46  ;;  %v1333_v48 = vunpack.i.l.bf16 %v1332_v46  ;;  %1372 = vrcp.f32 %v418_v45 }
 0x541   :  { %1374 = vrcp.f32 %v421_v42 }
 0x542   :  { %v1233_v54 = vpack.c.bf16 %v1334_v61, %v1333_v48  ;;  %v1365_v56 = vpop.eup %1364 }
 0x543   :  { %v1337_v49 = vpop.permute.xlu1 %1336  ;;  %v1367_v58 = vpop.eup %1366  ;;  %v432_v59 = vmul.f32 %v1365_v56, %v1353_v23  ;;  %v756_v56 = vld [vmem:[%s1778_s4 + $0x10] sm:$0xff] }
 0x544   :  { %v1339_v51 = vunpack.i.h.bf16 %v1337_v49  ;;  %v1338_v52 = vunpack.i.l.bf16 %v1337_v49  ;;  %1234 = vmatprep.subr.bf16.mxu0 %v1233_v54  ;;  %v433_v62 = vmul.f32 %v1367_v58, %v1620_v13 }
 0x545   :  { %1236 = vmatpush3.bf16.msra.mxu0 %v1233_v54 }
 0x546   :  { %v1237_v53 = vpack.c.bf16 %v1339_v51, %v1338_v52  ;;  %v1369_v60 = vpop.eup %1368  ;;  %v754_v52 = vld [vmem:[%s1778_s4] sm:$0xff] }
 0x547   :  { %v1371_v50 = vpop.eup %1370  ;;  %v434_v63 = vmul.f32 %v1369_v60, %v1357_v31  ;;  %v854_v60 = vld [vmem:[%s1779_s5 + $0x8] sm:$0xff] }
 0x548   :  { %1238 = vmatprep.subr.bf16.mxu0 %v1237_v53  ;;  %v435_v47 = vmul.f32 %v1371_v50, %v1624_v20 }
 0x549   :  { %1240 = vmatpush3.bf16.msra.mxu0 %v1237_v53  ;;  %v755_v53 = vld [vmem:[%s1778_s4 + $0x8] sm:$0xff] }
 0x54a   :  { %v1373_v2 = vpop.eup %1372  ;;  %1242 = vmatprep.subr.bf16.mxu0 %v1241_v8  ;;  %v1249_v55 = vpack.c.bf16 %v755_v53, %v754_v52 }
 0x54b   :  { %v1375_v3 = vpop.eup %1374  ;;  %v436_v4 = vmul.f32 %v1373_v2, %v1359_v34  ;;  %v712_v34 = vsub.s32 3, %v1522_v26 }
 0x54c   :  { %1125 = vmatmul.mubr.msk.f32.vlgmr.msra.gmra.mrb[2].mxu0 %vm349_vm3, %v431_v57  ;;  %v437_v5 = vmul.f32 %v1375_v3, %v1629_v28  ;;  %v757_v57 = vld [vmem:[%s1778_s4 + $0x18] sm:$0xff]  ;;  %v858_v3 = vld [vmem:[%s1779_s5 + $0x28] sm:$0xff] }
 0x54d   :  { %1127 = vmatprep.mubr.msk.f32.mxu0 %vm349_vm3, %v432_v59  ;;  %1244 = vmatpush3.bf16.msra.mxu0 %v1241_v8  ;;  %v713_v35 = vrot.slane %v1528_v29, %v712_v34  ;;  %v1253_v58 = vpack.c.bf16 %v757_v57, %v756_v56  ;;  %v853_v59 = vld [vmem:[%s1779_s5] sm:$0xff]  ;;  %v948_v57 = vsub.s32 7, %v1522_v26 }
 0x54e   :  { %1246 = vmatprep.subr.bf16.mxu0 %v1245_v11  ;;  %v1257_v50 = vpack.c.bf16 %v854_v60, %v853_v59  ;;  %v865_v34 = vld [vmem:[%s1779_s5 + $0x60] sm:$0xff] }
 0x550   :  { %1128 = vmatmul.mubr.msk.f32.gmra.mrb[4].mxu0 %vm349_vm3, %v433_v62  ;;  %v855_v62 = vld [vmem:[%s1779_s5 + $0x10] sm:$0xff]  ;;  %1258 = vmatprep.subr.bf16.mxu1 %v1257_v50 }
 0x551   :  { %1130 = vmatprep.mubr.msk.f32.mxu0 %vm349_vm3, %v434_v63  ;;  %1248 = vmatpush3.bf16.msra.mxu0 %v1245_v11  ;;  %v856_v63 = vld [vmem:[%s1779_s5 + $0x18] sm:$0xff]  ;;  %v744_v11 = vsub.s32 4, %v1522_v26 }
 0x552   :  { %1250 = vmatprep.subr.bf16.mxu0 %v1249_v55  ;;  %v1261_v2 = vpack.c.bf16 %v856_v63, %v855_v62  ;;  %1260 = vmatpush3.bf16.msra.mxu1 %v1257_v50 }
 0x554   :  { %1131 = vmatmul.mubr.msk.f32.gmra.mrb[6].mxu0 %vm349_vm3, %v435_v47  ;;  %v857_v47 = vld [vmem:[%s1779_s5 + $0x20] sm:$0xff]  ;;  %1262 = vmatprep.subr.bf16.mxu1 %v1261_v2 }
 0x555   :  { %1133 = vmatprep.mubr.msk.f32.mxu0 %vm349_vm3, %v436_v4  ;;  %v1265_v4 = vpack.c.bf16 %v858_v3, %v857_v47 }
 0x556   :  { %1264 = vmatpush3.bf16.msra.mxu1 %v1261_v2 }
 0x557   :  { %1266 = vmatprep.subr.bf16.mxu1 %v1265_v4 }
 0x558   :  { %1134 = vmatmul.mubr.msk.f32.gmra.mrb[8].mxu0 %vm349_vm3, %v437_v5 }
 0x55a   :  { %1268 = vmatpush3.bf16.msra.mxu1 %v1265_v4 }
 0x61f   :  { %v1126_v12 = vpop.f32.mrb[2].mxu0 }
 0x620   :  { %v552_v13 = vpop.f32.mrb[3].mxu0 }
 0x623   :  { %v1129_v14 = vpop.f32.mrb[4].mxu0 }
 0x624   :  { %595 = vrot.lane.b32.xlu1 %v1129_v14, %s1434_s12  ;;  %v562_v15 = vpop.f32.mrb[5].mxu0 }
 0x625   :  { %593 = vrot.lane.b32.xlu0 %v562_v15, %s1434_s12 }
 0x627   :  { %v1132_v16 = vpop.f32.mrb[6].mxu0 }
 0x628   :  { %603 = vrot.lane.b32.xlu1 %v1132_v16, %s1440_s26  ;;  %v572_v17 = vpop.f32.mrb[7].mxu0 }
 0x629   :  { %601 = vrot.lane.b32.xlu0 %v572_v17, %s1440_s26 }
 0x62b   :  { %v1135_v18 = vpop.f32.mrb[8].mxu0 }
 0x62c   :  { %611 = vrot.lane.b32.xlu1 %v1135_v18, %s1441_s27  ;;  %v582_v19 = vpop.f32.mrb[9].mxu0 }
 0x62d   :  { %609 = vrot.lane.b32.xlu0 %v582_v19, %s1441_s27 }
 0x696   :  { %v596_v20 = vpop.permute.xlu1 %595 }
 0x697   :  { %v594_v21 = vpop.permute.xlu0 %593  ;;  %v616_v27 = vsel %vm211_vm1, %v1126_v12, %v596_v20  ;;  %v750_v12 = vsub.s32 5, %v1522_v26 }
 0x698   :  { %v615_v24 = vsel %vm211_vm1, %v552_v13, %v594_v21  ;;  %v745_v13 = vrot.slane %v1528_v29, %v744_v11 }
 0x699   :  { %v751_v16 = vrot.slane %v1528_v29, %v750_v12 }
 0x69a   :  { %v604_v22 = vpop.permute.xlu1 %603 }
 0x69b   :  { %v602_v23 = vpop.permute.xlu0 %601  ;;  %v619_v31 = vsel %vm617_vm4, %v616_v27, %v604_v22  ;;  %v861_v27 = vld [vmem:[%s1779_s5 + $0x40] sm:$0xff] }
 0x69c   :  { %v618_v28 = vsel %vm617_vm4, %v615_v24, %v602_v23  ;;  %v859_v23 = vld [vmem:[%s1779_s5 + $0x30] sm:$0xff]  ;;  %v860_v24 = vld [vmem:[%s1779_s5 + $0x38] sm:$0xff] }
 0x69e   :  { %v612_v25 = vpop.permute.xlu1 %611 }
 0x69f   :  { %v610_v30 = vpop.permute.xlu0 %609  ;;  %v622_v33 = vsel %vm620_vm5, %v619_v31, %v612_v25  ;;  %v1269_v25 = vpack.c.bf16 %v860_v24, %v859_v23  ;;  %v863_v31 = vld [vmem:[%s1779_s5 + $0x50] sm:$0xff] }
 0x6a0   :  { %v621_v32 = vsel %vm620_vm5, %v618_v28, %v610_v30  ;;  %v862_v28 = vld [vmem:[%s1779_s5 + $0x48] sm:$0xff] }
 0x6a1   :  { %1144 = vmatprep.mubr.msk.f32.mxu0 %vm44_vm0, %v621_v32  ;;  %1270 = vmatprep.subr.bf16.mxu1 %v1269_v25  ;;  %v1273_v30 = vpack.c.bf16 %v862_v28, %v861_v27  ;;  %v864_v32 = vld [vmem:[%s1779_s5 + $0x58] sm:$0xff] }
 0x6a2   :  { %1145 = vmatmul.mubr.msk.f32.vlgmr.msra.gmra.mrb[10].mxu0 %vm44_vm0, %v622_v33  ;;  %1272 = vmatpush3.bf16.msra.mxu1 %v1269_v25  ;;  %v1277_v33 = vpack.c.bf16 %v864_v32, %v863_v31 }
 0x6a3   :  { %1252 = vmatpush3.bf16.msra.mxu0 %v1249_v55  ;;  %1274 = vmatprep.subr.bf16.mxu1 %v1273_v30 }
 0x6a4   :  { %1254 = vmatprep.subr.bf16.mxu0 %v1253_v58 }
 0x6a6   :  { %1276 = vmatpush3.bf16.msra.mxu1 %v1273_v30 }
 0x6a7   :  { %1256 = vmatpush3.bf16.msra.mxu0 %v1253_v58  ;;  %1278 = vmatprep.subr.bf16.mxu1 %v1277_v33  ;;  %v949_v58 = vrot.slane %v1528_v29, %v948_v57 }
 0x6aa   :  { %1280 = vmatpush3.bf16.msra.mxu1 %v1277_v33 }
 0x775   :  { %v1146_v36 = vpop.f32.mrb[10].mxu0 }
 0x776   :  { %v709_v37 = vadd.f32 %v1146_v36, %v1500_v1  ;;  %v699_v38 = vpop.f32.mrb[11].mxu0 }
 0x777   :  { %v708_v39 = vadd.f32 %v699_v38, %v1498_v0  ;;  %v868_v38 = vld [vmem:[%s1779_s5 + $0x78] sm:$0xff] }
 0x778   :  { %v1673_v40 = vadd.f32 %v713_v35, %v709_v37  ;;  %v867_v37 = vld [vmem:[%s1779_s5 + $0x70] sm:$0xff] }
 0x779   :  { %v1675_v41 = vadd.f32 %v713_v35, %v708_v39  ;;  %v866_v35 = vld [vmem:[%s1779_s5 + $0x68] sm:$0xff]  ;;  %v1285_v39 = vpack.c.bf16 %v868_v38, %v867_v37  ;;  %s1442_s5 = smov [#allocation5]  }
 0x77a   :  { %v719_v42 = vsel %vm44_vm0, %v1673_v40, 0.0  ;;  %v1281_v36 = vpack.c.bf16 %v866_v35, %v865_v34  ;;  %s959_s18 = sshll.u32 %s1442_s5, 4  ;;  %s960_s18 = int_to_ptr.vmem [resolvable:$true] %s959_s18 }
 0x77b   :  { %720 = vadd.xlane.f32.xlu1 %v719_v42  ;;  %v716_v43 = vsel %vm44_vm0, %v1675_v41, 0.0  ;;  %v760_v42 = vsub.s32 6, %v1522_v26  ;;  %s1406_s19 = scalar_lea.vmem %s960_s18, 256  ;;  %p1411_p9 = scmp.lt.s32.totalorder %s960_s18, %s960_s18 }
 0x77c   :  { %717 = vadd.xlane.f32.xlu0 %v716_v43  ;;  %1282 = vmatprep.subr.bf16.mxu1 %v1281_v36  ;;  %p1407_p8 = scmp.ne.s32.totalorder %s960_s18, %s1406_s19  ;;  %p1412_p10 = scmp.lt.s32.totalorder %s1406_s19, %s1406_s19 }
 0x77d   :  { %1284 = vmatpush3.bf16.msra.mxu1 %v1281_v36  ;;  %v761_v43 = vrot.slane %v1528_v29, %v760_v42 }
 0x77e   :  { %1286 = vmatprep.subr.bf16.mxu1 %v1285_v39  ;;  %p1413_p11 = por %p1412_p10, %p1411_p9 }
 0x780   :  { %p1414_p12 = pnand %p1413_p11, %p1407_p8 }
 0x781   :  { %1288 = vmatpush3.bf16.msra.mxu1 %v1285_v39 }
 0x808   :  { %v721_v44 = vpop.xlane.xlu1 %720 }
 0x809   :  { %v723_v45 = vmul.f32 0.03125, %v721_v44  ;;  %v718_v46 = vpop.xlane.xlu0 %717 }
 0x80a   :  { %v722_v61 = vmul.f32 0.03125, %v718_v46 }
 0x80b   :  { %v725_v1 = vsub.f32 %v1673_v40, %v723_v45 }
 0x80c   :  { %v724_v0 = vsub.f32 %v1675_v41, %v722_v61 }
 0x80d   :  { %v727_v49 = vmul.f32 %v725_v1, %v725_v1 }
 0x80e   :  { %v726_v48 = vmul.f32 %v724_v0, %v724_v0 }
 0x80f   :  { %v731_v51 = vsel %vm44_vm0, %v727_v49, 0.0 }
 0x810   :  { %v728_v54 = vsel %vm44_vm0, %v726_v48, 0.0 }
 0x811   :  { %729 = vadd.xlane.f32.xlu0 %v728_v54 }
 0x815   :  { %732 = vadd.xlane.f32.xlu0 %v731_v51 }
 0x89e   :  { %v730_v5 = vpop.xlane.xlu0 %729 }
 0x89f   :  { %v734_v6 = vmul.f32 0.03125, %v730_v5 }
 0x8a1   :  { %v736_v7 = vadd.f32 1e-05, %v734_v6 }
 0x8a2   :  { %v733_v8 = vpop.xlane.xlu0 %732 }
 0x8a3   :  { %1376 = vrsqrt.f32 %v736_v7  ;;  %v735_v9 = vmul.f32 0.03125, %v733_v8 }
 0x8a5   :  { %v737_v10 = vadd.f32 1e-05, %v735_v9 }
 0x8a7   :  { %1378 = vrsqrt.f32 %v737_v10 }
 0x8ad   :  { %v1377_v14 = vpop.eup %1376 }
 0x8ae   :  { %v740_v15 = vmul.f32 %v1377_v14, %v724_v0 }
 0x8b0   :  { %v746_v17 = vmul.f32 %v745_v13, %v740_v15 }
 0x8b1   :  { %v1379_v18 = vpop.eup %1378 }
 0x8b2   :  { %v741_v19 = vmul.f32 %v1379_v18, %v725_v1  ;;  %v752_v20 = vadd.f32 %v751_v16, %v746_v17 }
 0x8b4   :  { %v747_v21 = vmul.f32 %v745_v13, %v741_v19  ;;  %1155 = vmatprep.mubr.msk.f32.mxu0 %vm44_vm0, %v752_v20 }
 0x8b6   :  { %v753_v22 = vadd.f32 %v751_v16, %v747_v21 }
 0x8b8   :  { %1156 = vmatmul.mubr.msk.f32.vlgmr.msra.gmra.mrb[12].mxu0 %vm44_vm0, %v753_v22 }
 0x98b   :  { %v1157_v44 = vpop.f32.mrb[12].mxu0 }
 0x98c   :  { %v840_v45 = vadd.f32 %v1157_v44, %v761_v43  ;;  %v834_v46 = vpop.f32.mrb[13].mxu0 }
 0x98d   :  { %v835_v61 = vadd.f32 %v834_v46, %v761_v43 }
 0x98e   :  { %v846_v1 = vmul.f32 0.70710677, %v840_v45  ;;  %v844_v53 = vmul.f32 0.5, %v840_v45 }
 0x98f   :  { %v845_v0 = vmul.f32 0.70710677, %v835_v61  ;;  %v843_v51 = vmul.f32 0.5, %v835_v61 }
 0x990   :  { %1380 = verf.f32 %v846_v1 }
 0x991   :  { %1382 = verf.f32 %v845_v0 }
 0x99a   :  { %v1381_v48 = vpop.eup %1380 }
 0x99b   :  { %v1383_v54 = vpop.eup %1382  ;;  %v850_v49 = vadd.f32 1.0, %v1381_v48 }
 0x99c   :  { %v849_v52 = vadd.f32 1.0, %v1383_v54 }
 0x99d   :  { %v852_v56 = vmul.f32 %v850_v49, %v844_v53 }
 0x99e   :  { %v851_v55 = vmul.f32 %v849_v52, %v843_v51 }
 0x9a0   :  { %1190 = vmatprep.mubr.f32.mxu1 %v851_v55 }
 0x9a1   :  { %1191 = vmatmul.mubr.f32.vlgmr.msra.gmra.mrb[8].mxu1 %v852_v56 }
 0xa74   :  { %v1192_v59 = vpop.f32.mrb[8].mxu1 }
 0xa75   :  { %v945_v60 = vadd.f32 %v1192_v59, %v1673_v40  ;;  %v935_v62 = vpop.f32.mrb[9].mxu1 }
 0xa76   :  { %v944_v50 = vadd.f32 %v935_v62, %v1675_v41 }
 0xa77   :  { %v951_v63 = vadd.f32 %v949_v58, %v945_v60 }
 0xa78   :  { %v950_v2 = vadd.f32 %v949_v58, %v944_v50 }
 0xa79   :  { %953 = vst.msk [vmem:[#allocation5 + $0x8] sm:$0xff] %vm44_vm0, %v951_v63 }
 0xa7a   :  { %952 = vst.msk [vmem:[#allocation5] sm:$0xff] %vm44_vm0, %v950_v2 }
 0xa7b   :  { %1417 = shalt.err (!%p1414_p12)
}
 0xa7c   :  { %s1418_s1 = scalar_lea.hbm %s1781_s7, 256 }
 0xa7d   :  { %p1419_p13 = scmp.ne.s32.totalorder %s1781_s7, %s1418_s1  ;;  %p1422_p0 = scmp.lt.u32.totalorder %s1418_s1, %s1781_s7 }
 0xa7f   :  { %p1424_p1 = pnand %p1422_p0, %p1419_p13 }
 0xa81   :  { %1427 = shalt.err (!%p1424_p1)
}
 0xa82   :  { %965 = dma.vmem_to_hbm [thread:$0]  %s960_s18, 256, %s1781_s7, [#allocation4], %s1433_s11, %s1433_s11, %s1434_s12  }
 0xa83   :  { %1430 = dma.done.wait [#allocation4], 256  }
 0xa84   :  { %1431 = vsyncadd [#allocation4], 4294967040 }
 0xa85   :  { %969 = vsyncpa [#allocation3], 1 }
 0xa86   :  { %970 = vsyncpa [#allocation4], 1 }

</bundles_post_ra>
